<compile_context>
chip_gen: v7x
topology: tpu7x:2x2x1
jax: 0.10.0
libtpu: 0.0.40
codegen_flags: <defaults>
</compile_context>

<pallas_src>
import jax
import jax.numpy as jnp
from jax.experimental import pallas as pl
from jax.experimental.pallas import tpu as pltpu


def _pick_tile(hw, *, prefer_split=False):
    """Largest of (512, 256, 128) dividing hw; optionally insist on >= 2 tiles
    so both v7x TensorCores get work when N == 1."""
    cands = (512, 256, 128)
    if prefer_split:
        for t in cands:
            if hw % t == 0 and hw // t >= 2:
                return t
    for t in cands:
        if hw % t == 0:
            return t
    # TODO(synk): ragged HW (no 128-divisor) falls back to a single full-HW tile;
    # pad spatially before calling if HW*HW temporaries would not fit VMEM.
    return hw


def _vmem_limit_bytes():
    phys = 64 * 1024 * 1024  # conservative default (v7x per-TC VMEM)
    try:
        phys = int(pltpu.get_tpu_info().vmem_capacity_bytes)
    except Exception:
        pass
    # ~75% of physical: 96 MiB on v5e/v6e (128 MiB), 48 MiB on v7x (64 MiB).
    return int(min(phys * 3 // 4, 112 * 1024 * 1024))


def spatial_attention_block(a_nchw, params, *, tq=None, tk=None):
    """a_nchw: (N, C, H, W) float32.  Returns (N, C, H, W) float32."""
    N, C, H, W = a_nchw.shape
    assert C % 8 == 0, "in_channels must be divisible by 8 (module uses C // 8)"
    HW = H * W
    C8 = C // 8
    CT = 2 * C8 + C + 1  # stacked projection rows: [b; c; d; ones]

    if tq is None:
        tq = _pick_tile(HW, prefer_split=(N == 1))
    if tk is None:
        tk = _pick_tile(HW)
    assert HW % tq == 0 and HW % tk == 0, "tile sizes must divide H*W"

    # channels-first, flattened spatial: pure reshape of NCHW (no transpose).
    x = a_nchw.reshape(N, C, HW).astype(jnp.float32)
    alpha = params["alpha"].reshape(1, 1).astype(jnp.float32)

    # Stacked projection [Wb; Wc; Wd; 0] / [bb; bc; bd; 1] -> one matmul, and the
    # trailing ones row becomes the row-sum row of d_aug.
    w_aug = jnp.concatenate(
        [params["wb"], params["wc"], params["wd"],
         jnp.zeros((1, C), jnp.float32)], axis=0).astype(jnp.bfloat16)      # (CT, C)
    b_aug = jnp.concatenate(
        [params["bb"], params["bc"], params["bd"], jnp.ones((1,), jnp.float32)]
    ).reshape(CT, 1).astype(jnp.float32)                                    # (CT, 1)

    vmem_limit = _vmem_limit_bytes()

    # ----------------- stage 1: fused projection prologue -----------------
    tp = _pick_tile(HW)

    def proj_kernel(x_ref, w_ref, bias_ref, b_ref, c_ref, d_ref):
        xt = x_ref[0].astype(jnp.bfloat16)                                   # (C, TP)
        y = jax.lax.dot_general(
            w_ref[...], xt, (((1,), (0,)), ((), ())),
            preferred_element_type=jnp.float32) + bias_ref[...]              # (CT, TP) f32
        b_ref[0] = y[:C8].astype(jnp.bfloat16)
        c_ref[0] = y[C8:2 * C8].astype(jnp.bfloat16)
        d_ref[0] = y[2 * C8:].astype(jnp.bfloat16)                           # [d; ones]

    bp, cp, dp = pl.pallas_call(
        proj_kernel,
        out_shape=(
            jax.ShapeDtypeStruct((N, C8, HW), jnp.bfloat16),
            jax.ShapeDtypeStruct((N, C8, HW), jnp.bfloat16),
            jax.ShapeDtypeStruct((N, C + 1, HW), jnp.bfloat16),
        ),
        grid=(N, HW // tp),
        in_specs=[
            pl.BlockSpec((1, C, tp), lambda n, t: (n, 0, t)),    # x tile
            pl.BlockSpec((CT, C), lambda n, t: (0, 0)),          # stacked weights
            pl.BlockSpec((CT, 1), lambda n, t: (0, 0)),          # stacked bias
        ],
        out_specs=(
            pl.BlockSpec((1, C8, tp), lambda n, t: (n, 0, t)),
            pl.BlockSpec((1, C8, tp), lambda n, t: (n, 0, t)),
            pl.BlockSpec((1, C + 1, tp), lambda n, t: (n, 0, t)),
        ),
        compiler_params=pltpu.CompilerParams(
            dimension_semantics=("parallel", "parallel")),
    )(x, w_aug, b_aug)

    # ----------------- stage 2: flash-style spatial attention -----------------
    # VMEM budget: make the per-batch key slabs (c', d_aug, bf16, double-buffered)
    # resident when they + per-step working set fit comfortably.
    key_bytes = 2 * 2 * (C8 + C + 1) * HW                 # bf16, x2 buffers
    step_bytes = (2 * 2 * C8 * tq                         # b' query tile (bf16, x2)
                  + 2 * 4 * C * tq * 2                    # x residual in + out (f32, x2)
                  + 4 * (C + 2) * tq                      # acc + m scratch (f32)
                  + 10 * tq * tk)                         # k_t / p_t temporaries
    resident = (key_bytes + step_bytes) < int(0.6 * vmem_limit)

    def pam_kernel(alpha_ref, b_ref, xq_ref, c_ref, d_ref, o_ref, m_scr, acc_scr):
        kj = pl.program_id(2)

        @pl.when(kj == 0)
        def _init():
            m_scr[...] = jnp.full_like(m_scr, -jnp.inf)
            acc_scr[...] = jnp.zeros_like(acc_scr)

        if resident:
            # key slabs are per-batch resident; slice the current key tile.
            koff = pl.multiple_of(kj * tk, tk)
            c_k = c_ref[0, :, pl.ds(koff, tk)]             # (C8,  TK) bf16
            d_k = d_ref[0, :, pl.ds(koff, tk)]             # (C+1, TK) bf16
        else:
            c_k = c_ref[0]                                 # (C8,  TK) bf16
            d_k = d_ref[0]                                 # (C+1, TK) bf16

        b_q = b_ref[0]                                     # (C8, TQ) bf16

        # energy with keys on sublanes / queries on lanes: k_t[j, i] = <c_j, b_i>
        k_t = jax.lax.dot_general(
            c_k, b_q, (((0,), (0,)), ((), ())),
            preferred_element_type=jnp.float32)            # (TK, TQ) f32

        # online softmax over the key axis; per-query state is (1, TQ)
        m_prev = m_scr[...]
        m_new = jnp.maximum(m_prev, jnp.max(k_t, axis=0, keepdims=True))
        corr = jnp.exp(m_prev - m_new)                     # (1, TQ)
        p_t = jnp.exp(k_t - m_new)                         # (TK, TQ) f32 (v5e-safe)

        # [d; 1] @ p_t: rows 0..C-1 = weighted values, row C = sum_j p (MXU-folded)
        acc_scr[...] = corr * acc_scr[...] + jax.lax.dot_general(
            d_k, p_t.astype(jnp.bfloat16), (((1,), (0,)), ((), ())),
            preferred_element_type=jnp.float32)            # (C+1, TQ)
        m_scr[...] = m_new

        @pl.when(kj == pl.num_programs(2) - 1)
        def _finish():
            acc = acc_scr[...]
            # deferred normalization; alpha folded into the (1, TQ) scale.
            scale = alpha_ref[0, 0] * pl.reciprocal(acc[C:], approx=True)
            o_ref[0] = acc[:C] * scale + xq_ref[0]

    if resident:
        c_spec = pl.BlockSpec((1, C8, HW), lambda n, qi, kj: (n, 0, 0))
        d_spec = pl.BlockSpec((1, C + 1, HW), lambda n, qi, kj: (n, 0, 0))
    else:
        c_spec = pl.BlockSpec((1, C8, tk), lambda n, qi, kj: (n, 0, kj))
        d_spec = pl.BlockSpec((1, C + 1, tk), lambda n, qi, kj: (n, 0, kj))

    out = pl.pallas_call(
        pam_kernel,
        out_shape=jax.ShapeDtypeStruct((N, C, HW), jnp.float32),
        grid=(N, HW // tq, HW // tk),
        in_specs=[
            pl.BlockSpec(memory_space=pltpu.SMEM),                        # alpha (1,1)
            pl.BlockSpec((1, C8, tq), lambda n, qi, kj: (n, 0, qi)),      # b' query tile
            pl.BlockSpec((1, C, tq), lambda n, qi, kj: (n, 0, qi)),       # x residual tile
            c_spec,                                                       # c' keys
            d_spec,                                                       # [d'; 1] keys
        ],
        out_specs=pl.BlockSpec((1, C, tq), lambda n, qi, kj: (n, 0, qi)),
        scratch_shapes=[
            pltpu.VMEM((1, tq), jnp.float32),        # running max
            pltpu.VMEM((C + 1, tq), jnp.float32),    # [value acc; row-sum] accumulator
        ],
        compiler_params=pltpu.CompilerParams(
            # n and query-tile axes are independent (megacore / v7x 2-TC sharding);
            # key-tile axis carries the online-softmax accumulator.
            dimension_semantics=("parallel", "parallel", "arbitrary"),
            vmem_limit_bytes=vmem_limit,
        ),
    )(alpha, bp, x, cp, dp)

    # (N, C, HW) -> NCHW is a free reshape (no transpose).
    return out.reshape(N, C, H, W)


def reference(a_nchw, params):
    """Pure-f32 JAX reference mirroring the PyTorch forward exactly."""
    N, C, H, W = a_nchw.shape
    HW = H * W
    x = a_nchw.astype(jnp.float32)

    def conv1x1(w, bias):  # w: (C_out, C_in), bias: (C_out,)
        return jnp.einsum("oc,nchw->nohw", w, x) + bias[None, :, None, None]

    b = conv1x1(params["wb"], params["bb"]).reshape(N, -1, HW)
    c = conv1x1(params["wc"], params["bc"]).reshape(N, -1, HW)
    d = conv1x1(params["wd"], params["bd"]).reshape(N, -1, HW)
    k = jnp.einsum("nci,ncj->nij", b, c)          # b'^T @ c'
    s = jax.nn.softmax(k, axis=-1)
    kl = jnp.einsum("ncj,nij->nci", d, s)         # d' @ s^T
    return params["alpha"].reshape(()) * kl.reshape(N, C, H, W) + x


if __name__ == "__main__":
    # C must be divisible by 8 (module uses in_channels // 8).
    N, C, H, W = 2, 16, 16, 16
    C8 = C // 8

    key = jax.random.PRNGKey(0)
    k_a, k_wb, k_bb, k_wc, k_bc, k_wd, k_bd = jax.random.split(key, 7)

    a = jax.random.normal(k_a, (N, C, H, W), dtype=jnp.float32)

    # alpha is initialized to 0 in the module; use a nonzero value so the
    # attention path is actually exercised.
    params = {
        "alpha": jnp.array([0.5], dtype=jnp.float32),
        "wb": jax.random.normal(k_wb, (C8, C), dtype=jnp.float32) * 0.1,  # b_conv weight
        "bb": jax.random.normal(k_bb, (C8,), dtype=jnp.float32) * 0.1,
        "wc": jax.random.normal(k_wc, (C8, C), dtype=jnp.float32) * 0.1,  # c_conv weight
        "bc": jax.random.normal(k_bc, (C8,), dtype=jnp.float32) * 0.1,
        "wd": jax.random.normal(k_wd, (C, C), dtype=jnp.float32) * 0.1,   # d_conv weight
        "bd": jax.random.normal(k_bd, (C,), dtype=jnp.float32) * 0.1,
    }

    # tq = tk = 128 so the 16x16 example runs a (2, 2, 2) grid and genuinely
    # exercises the multi-tile online-softmax + resident-key path.
    out = spatial_attention_block(a, params, tq=128, tk=128)
    out = jax.block_until_ready(out)

    ref = reference(a, params)
    assert out.shape == (N, C, H, W)
    err = float(jnp.max(jnp.abs(out - ref)))
    # bf16 MXU operands / bf16 projections + approx reciprocal => looser tolerance.
    assert err < 2e-2, f"mismatch vs. reference, max abs err {err}"

    print("KERNEL_OK")
</pallas_src>

<mosaic_0001>
module attributes {stable_mosaic.version = 11 : i64} {
  func.func @proj_kernel(%arg0: i32, %arg1: i32, %arg2: memref<1x16x256xf32, #tpu.memory_space<vmem>>, %arg3: memref<21x16xbf16, #tpu.memory_space<vmem>>, %arg4: memref<21x1xf32, #tpu.memory_space<vmem>>, %arg5: memref<1x2x256xbf16, #tpu.memory_space<vmem>>, %arg6: memref<1x2x256xbf16, #tpu.memory_space<vmem>>, %arg7: memref<1x17x256xbf16, #tpu.memory_space<vmem>>) attributes {dimension_semantics = [#tpu.dimension_semantics<parallel>, #tpu.dimension_semantics<parallel>], iteration_bounds = array<i64: 2, 1>, scalar_prefetch = 0 : i64, scratch_operands = 0 : i64, tpu.core_type = #tpu.core_type<tc>, window_params = [{transform_indices = @transform_0, window_bounds = array<i64: 1, 16, 256>}, {pipeline_mode = #tpu.pipeline_mode<synchronous>, transform_indices = @transform_1, window_bounds = array<i64: 21, 16>}, {pipeline_mode = #tpu.pipeline_mode<synchronous>, transform_indices = @transform_2, window_bounds = array<i64: 21, 1>}, {transform_indices = @transform_3, window_bounds = array<i64: 1, 2, 256>}, {transform_indices = @transform_4, window_bounds = array<i64: 1, 2, 256>}, {transform_indices = @transform_5, window_bounds = array<i64: 1, 17, 256>}]} {
    %c0 = arith.constant 0 : index
    %c0_0 = arith.constant 0 : index
    %c0_1 = arith.constant 0 : index
    %0 = vector.load %arg2[%c0, %c0_0, %c0_1] : memref<1x16x256xf32, #tpu.memory_space<vmem>>, vector<1x16x256xf32>
    %1 = vector.shape_cast %0 : vector<1x16x256xf32> to vector<16x256xf32>
    %2 = arith.truncf %1 : vector<16x256xf32> to vector<16x256xbf16>
    %c0_2 = arith.constant 0 : index
    %c0_3 = arith.constant 0 : index
    %3 = vector.load %arg3[%c0_2, %c0_3] : memref<21x16xbf16, #tpu.memory_space<vmem>>, vector<21x16xbf16>
    %cst = arith.constant dense<0.000000e+00> : vector<21x256xf32>
    %4 = tpu.matmul %3, %2, %cst {dimension_numbers = #tpu.dot_dimension_numbers<[1], [0], [0], [1], [0, 0, 1, 1], [], []>} : vector<21x16xbf16>, vector<16x256xbf16>, vector<21x256xf32> -> vector<21x256xf32>
    %c0_4 = arith.constant 0 : index
    %c0_5 = arith.constant 0 : index
    %5 = vector.load %arg4[%c0_4, %c0_5] : memref<21x1xf32, #tpu.memory_space<vmem>>, vector<21x1xf32>
    %6 = vector.broadcast %5 : vector<21x1xf32> to vector<21x256xf32>
    %7 = arith.addf %4, %6 : vector<21x256xf32>
    %8 = vector.extract_strided_slice %7 {offsets = [0, 0], sizes = [2, 256], strides = [1, 1]} : vector<21x256xf32> to vector<2x256xf32>
    %9 = arith.truncf %8 : vector<2x256xf32> to vector<2x256xbf16>
    %c0_6 = arith.constant 0 : index
    %c0_7 = arith.constant 0 : index
    %c0_8 = arith.constant 0 : index
    %10 = vector.load %arg5[%c0_6, %c0_7, %c0_8] : memref<1x2x256xbf16, #tpu.memory_space<vmem>>, vector<1x2x256xbf16>
    %11 = vector.shape_cast %10 : vector<1x2x256xbf16> to vector<2x256xbf16>
    %12 = vector.shape_cast %9 : vector<2x256xbf16> to vector<1x2x256xbf16>
    tpu.vector_store %arg5[%c0_6, %c0_7, %c0_8], %12 {strides = array<i32>} : memref<1x2x256xbf16, #tpu.memory_space<vmem>>, vector<1x2x256xbf16>,
    %13 = vector.extract_strided_slice %7 {offsets = [2, 0], sizes = [2, 256], strides = [1, 1]} : vector<21x256xf32> to vector<2x256xf32>
    %14 = arith.truncf %13 : vector<2x256xf32> to vector<2x256xbf16>
    %c0_9 = arith.constant 0 : index
    %c0_10 = arith.constant 0 : index
    %c0_11 = arith.constant 0 : index
    %15 = vector.load %arg6[%c0_9, %c0_10, %c0_11] : memref<1x2x256xbf16, #tpu.memory_space<vmem>>, vector<1x2x256xbf16>
    %16 = vector.shape_cast %15 : vector<1x2x256xbf16> to vector<2x256xbf16>
    %17 = vector.shape_cast %14 : vector<2x256xbf16> to vector<1x2x256xbf16>
    tpu.vector_store %arg6[%c0_9, %c0_10, %c0_11], %17 {strides = array<i32>} : memref<1x2x256xbf16, #tpu.memory_space<vmem>>, vector<1x2x256xbf16>,
    %18 = vector.extract_strided_slice %7 {offsets = [4, 0], sizes = [17, 256], strides = [1, 1]} : vector<21x256xf32> to vector<17x256xf32>
    %19 = arith.truncf %18 : vector<17x256xf32> to vector<17x256xbf16>
    %c0_12 = arith.constant 0 : index
    %c0_13 = arith.constant 0 : index
    %c0_14 = arith.constant 0 : index
    %20 = vector.load %arg7[%c0_12, %c0_13, %c0_14] : memref<1x17x256xbf16, #tpu.memory_space<vmem>>, vector<1x17x256xbf16>
    %21 = vector.shape_cast %20 : vector<1x17x256xbf16> to vector<17x256xbf16>
    %22 = vector.shape_cast %19 : vector<17x256xbf16> to vector<1x17x256xbf16>
    tpu.vector_store %arg7[%c0_12, %c0_13, %c0_14], %22 {strides = array<i32>} : memref<1x17x256xbf16, #tpu.memory_space<vmem>>, vector<1x17x256xbf16>,
    return
  }
  func.func @transform_0(%arg0: i32, %arg1: i32) -> (i32, i32, i32) {
    %c0_i32 = arith.constant 0 : i32
    %c0_i32_0 = arith.constant 0 : i32
    return %arg0, %c0_i32, %arg1 : i32, i32, i32
  }
  func.func @transform_1(%arg0: i32, %arg1: i32) -> (i32, i32) {
    %c0_i32 = arith.constant 0 : i32
    %c0_i32_0 = arith.constant 0 : i32
    %c0_i32_1 = arith.constant 0 : i32
    return %c0_i32, %c0_i32_0 : i32, i32
  }
  func.func @transform_2(%arg0: i32, %arg1: i32) -> (i32, i32) {
    %c0_i32 = arith.constant 0 : i32
    %c0_i32_0 = arith.constant 0 : i32
    %c0_i32_1 = arith.constant 0 : i32
    return %c0_i32, %c0_i32_0 : i32, i32
  }
  func.func @transform_3(%arg0: i32, %arg1: i32) -> (i32, i32, i32) {
    %c0_i32 = arith.constant 0 : i32
    %c0_i32_0 = arith.constant 0 : i32
    return %arg0, %c0_i32, %arg1 : i32, i32, i32
  }
  func.func @transform_4(%arg0: i32, %arg1: i32) -> (i32, i32, i32) {
    %c0_i32 = arith.constant 0 : i32
    %c0_i32_0 = arith.constant 0 : i32
    return %arg0, %c0_i32, %arg1 : i32, i32, i32
  }
  func.func @transform_5(%arg0: i32, %arg1: i32) -> (i32, i32, i32) {
    %c0_i32 = arith.constant 0 : i32
    %c0_i32_0 = arith.constant 0 : i32
    return %arg0, %c0_i32, %arg1 : i32, i32, i32
  }
}

</mosaic_0001>

<bundles_post_ra>
// kernel: tpu_custom_call.1
= control target key start
LH: loop header
LB: loop body
LE: loop exit
PB: predicated region body
PF: predicated region fallthrough
CT: control target
= control target key end

     0   :  { %11 = vsyncpa [#allocation3], 0  ;;  %s1243_s0 = inlined_call_operand.hbm [shape: f32[2,16,256], index: 0, kind: input, shape index: {}]   ;;  %s1244_s1 = inlined_call_operand.vmem [shape: bf16[21,16], index: 1, kind: input, shape index: {}]   ;;  %s1245_s2 = inlined_call_operand.vmem [shape: f32[21,1], index: 2, kind: input, shape index: {}]   ;;  %s1246_s3 = inlined_call_operand.hbm [shape: bf16[2,2,256], index: 3, kind: output, shape index: {0}]   ;;  %s1247_s4 = inlined_call_operand.hbm [shape: bf16[2,2,256], index: 4, kind: output, shape index: {1}]   ;;  %s1248_s5 = inlined_call_operand.vmem [shape: bf16[2,17,256], index: 5, kind: output, shape index: {2}]  }
   0x1   :  { %13 = vsyncpa [#allocation3 + $0x1], 0 }
   0x2   :  { %14 = vsyncpa [#allocation4], 0 }
   0x3   :  { %16 = vsyncpa [#allocation4 + $0x1], 0 }
   0x4   :  { %17 = vsyncpa [#allocation7], 0 }
   0x5   :  { %19 = vsyncpa [#allocation7 + $0x1], 0  ;;  %s973_s18 = smov 0   ;;  %s975_s19 = smov 0  }
   0x6   :  { %s977_s20 = smov 0   ;;  %s979_s21 = smov 0  }
   0x7   :  { %s981_s22 = smov 0   ;;  %s983_s23 = smov 0  }
   0x8 LB: > { %s675_s24 = sadd.s32 4294967295, %s934_s23   ;;  %s676_s25 = sadd.s32 4294967294, %s934_s23   ;;  %s934_s23 = sphi %s983_s23, %s25_s23   ;;  %s930_s22 = sphi %s981_s22, %s1269_s22   ;;  %s926_s21 = sphi %s979_s21, %s1268_s21   ;;  %s922_s20 = sphi %s977_s20, %s1267_s20   ;;  %s918_s19 = sphi %s975_s19, %s1266_s19   ;;  %s914_s18 = sphi %s973_s18, %s1265_s18  }
   0x9   : > { %s37_s26 = sadd.s32 1, %s930_s22  ;;  %s46_s27 = sadd.s32 1, %s922_s20 }
   0xa   : > { %p39_p0 = scmp.ge.s32.totalorder %s37_s26, 2  ;;  %p53_p1 = scmp.ne.s32.totalorder %s922_s20, %s918_s19 }
   0xb   : > { %p54_p2 = scmp.eq.s32.totalorder %s934_s23, 0  ;;  %p59_p3 = scmp.ne.s32.totalorder %s918_s19, %s914_s18 }
   0xc   : > { %s1271_s26 = smov (%p39_p0, %s37_s26), 0  ;;  %p60_p5 = scmp.eq.s32.totalorder %s675_s24, 0 }
   0xd   : > { %p1014_p4 = por %p54_p2, %p53_p1  ;;  %s41_s29 = ssub.s32 %s930_s22, %s1271_s26 }
   0xe   : > { %p127_p6 = scmp.eq.s32.totalorder %s675_s24, 1  ;;  %p44_p7 = scmp.eq.s32.totalorder %s41_s29, 0 }
   0xf   : > { %p1020_p8 = por %p60_p5, %p59_p3  ;;  %p133_p10 = scmp.eq.s32.totalorder %s676_s25, 1 }
  0x10   : > { %p1024_p9 = por %p127_p6, %p53_p1  ;;  %p732_p13 = scmp.lt.s32.totalorder %s934_s23, 2 }
  0x11   : > { %s1029_s7 = scalar_select %p44_p7, %s922_s20, %s46_s27  }
  0x12   : > { %s1252_s6 = scalar_select %p1024_p9, 1, 0 }
  0x13   : > { %p1031_p11 = por %p133_p10, %p59_p3  ;;  %s215_s9 = sand.u32 1, %s922_s20  }
  0x14   : > { %s679_s10 = sshll.u32 %s215_s9, 5  ;;  %s706_s11 = sshll.u32 %s930_s22, 9 }
  0x15   : > { %s1253_s8 = scalar_select %p1031_p11, 1, 0 }
  0x16   : > { %s1042_s14 = scalar_lea.hbm %s1243_s0, %s706_s11  ;;  %s219_s15 = scalar_lea.vmem [#allocation2], %s679_s10 }
  0x17   : > { %s228_s16 = sshll.u32 %s219_s15, 4  ;;  %p1048_p0 = pnand %p732_p13, %p1014_p4  ;;  %s1044_s16 = int_to_ptr.vmem [resolvable:$true] %s228_s16 }
  0x18   : > { %s1053_s24 = scalar_lea.sflag [#allocation3], %s215_s9  ;;  %s790_s25 = scalar_lea.hbm %s1042_s14, 512 }
  0x19   : > { %p791_p2 = scmp.ne.s32.totalorder %s1042_s14, %s790_s25  ;;  %p792_p3 = pneg %p1048_p0 }
  0x1a   : > { %s795_s28 = scalar_lea.hbm %s1243_s0, 1024  ;;  %p796_p4 = scmp.lt.u32.totalorder %s1042_s14, %s1243_s0 }
  0x1b   : > { %p793_p5 = pnand %p792_p3, %p791_p2  ;;  %p797_p7 = scmp.lt.u32.totalorder %s795_s28, %s790_s25 }
  0x1c   : > { %p799_p13 = scmp.lt.u32.totalorder %s790_s25, %s1042_s14 }
  0x1d   : > { %p794_p6 = pneg %p793_p5  ;;  %p798_p10 = por %p797_p7, %p796_p4 }
  0x1f   : > { %p800_p12 = por %p799_p13, %p798_p10 }
  0x21   : > { %p801_p1 = pnand %p800_p12, %p794_p6 }
  0x23   : > { %804 = shalt.err (!%p801_p1)
}
  0x24   : > { %s805_s9 = scalar_lea.vmem %s1044_s16, 512  ;;  %s936_s12 = smov [#allocation2]  }
  0x25   : > { %p806_p2 = scmp.ne.s32.totalorder %s1044_s16, %s805_s9  ;;  %s810_s13 = sshll.u32 %s936_s12, 4  ;;  %s811_s13 = int_to_ptr.vmem [resolvable:$false] %s810_s13 }
  0x26   : > { %s812_s15 = scalar_lea.vmem %s811_s13, 1024  ;;  %p813_p9 = scmp.lt.s32.totalorder %s1044_s16, %s811_s13 }
  0x27   : > { %p808_p5 = pnand %p806_p2, %p792_p3  ;;  %p814_p4 = scmp.lt.s32.totalorder %s812_s15, %s805_s9 }
  0x29   : > { %p809_p11 = pneg %p808_p5  ;;  %p815_p7 = por %p814_p4, %p813_p9 }
  0x2b   : > { %p816_p10 = pnand %p815_p7, %p809_p11 }
  0x2d   : > { %819 = shalt.err (!%p816_p10)
}
  0x2e   : > { %s937_s25 = smov 256   ;;  %s938_s27 = smov 16  }
  0x2f   : > { %724 = dma.hbm_to_vmem [thread:$0]  (!%p1048_p0), %s1042_s14, 512, %s1044_s16, %s1053_s24, %s937_s25, %s937_s25, %s938_s27  }
  0x30   : > { %p236_p12 = scmp.lt.s32.totalorder %s934_s23, 3  ;;  %p1255_p1 = scmp.ge.s32.totalorder %s934_s23, 1 }
  0x32   : > { %p237_p3 = pnand %p1255_p1, %p236_p12 }
  0x33   : > { %s1085_s29 = sand.u32 (!%p237_p3), 1, %s918_s19  }
  0x34   : > { %240 = sbr.rel (%p237_p3) target bundleno = 324 (0x144), region = 32  ;;  %s683_s28 = sshll.u32 (!%p237_p3), %s1085_s29, 5 }
  0x35   : > { %s243_s10 = scalar_lea.sflag (!%p237_p3), [#allocation3], %s1085_s29  ;;  %s246_s11 = scalar_lea.vmem (!%p237_p3), [#allocation2], %s683_s28 }
  0x3b   : > { %901 = dma.done.wait (%p1020_p8), %s243_s10, 512  }
  0x3c   : > { %903 = vsyncadd (%p1020_p8), %s243_s10, 4294966784  ;;  %v939_v0 = vmov 0   ;;  %v302_v1 = vld [vmem:[%s246_s11 + $0x8] sm:$0xff]  ;;  %v304_v2 = vld [vmem:[%s246_s11 + $0x18] sm:$0xff]  ;;  %vm336_vm0 = vcmask 130048   ;;  %p291_p8 = scmp.lt.s32.totalorder %s926_s21, 1  ;;  %v402_v15 = vlaneseq }
  0x3d   : > { %375 = vmatprep.mubr.bf16.mxu0 %v939_v0  ;;  %385 = vmatprep.mubr.bf16.mxu1 %v939_v0  ;;  %v301_v3 = vld [vmem:[%s246_s11] sm:$0xff]  ;;  %v306_v4 = vpack.c.bf16 %v304_v2, %v302_v1  ;;  %v303_v5 = vld [vmem:[%s246_s11 + $0x10] sm:$0xff]  ;;  %v789_v8 = vld [vmem:[%s1244_s1 + $0x8] ss:$0 sps:$4 sm:$0x77]   ;;  %vm458_vm1 = vcmask 1040384  }
  0x3e   : > { %786 = vset.pattern.permute.xlu0 %v939_v0  ;;  %787 = vset.pattern.permute.xlu1 %v939_v0  ;;  %v305_v6 = vpack.c.bf16 %v303_v5, %v301_v3  ;;  %v788_v7 = vld [vmem:[%s1244_s1] sm:$0xff]   ;;  %v312_v10 = vld [vmem:[%s1245_s2 + $0x10] sm:$0x1f]  ;;  %v311_v11 = vld [vmem:[%s1245_s2 + $0x8] sm:$0xff]  ;;  %v940_v13 = vmov 1966171168  }
  0x3f   : > { %343 = vmatprep.subr.bf16.mxu0 %v306_v4  ;;  %712 = vmatprep.subr.bf16.mxu1 %v306_v4  ;;  %v310_v9 = vld [vmem:[%s1245_s2] sm:$0xff]  ;;  %v400_v14 = vunpack.c.l.s4 %v940_v13  ;;  %s1110_s27 = scalar_select %p291_p8, %s926_s21, 1  ;;  %v403_v17 = vshrl.u32 %v402_v15, 7  ;;  %vm459_vm2 = vsmask.f32 256  ;;  %vm461_vm3 = vcmask 1044484  }
  0x40   : > { %344 = vmatpush1.bf16.msra.mxu0 %v305_v6  ;;  %713 = vmatpush1.bf16.msra.mxu1 %v305_v6  ;;  %s684_s28 = sshll.u32 %s1085_s29, 1  ;;  %vm462_vm4 = vsmask.f32 4352  ;;  %vm1114_vm5 = vmand %vm458_vm1, %vm459_vm2  ;;  %vm442_vm7 = vcmask 1041408   ;;  %s710_s11 = sshll.u32 %s926_s21, 5  ;;  %vm443_vm8 = vcmask 1045508  }
  0x41   : > { %315 = vperm.xlu0 %786, %v310_v9   ;;  %325 = vperm.xlu1 %787, %v312_v10   ;;  %v401_v16 = vunpack.c.0.s8 %v400_v14  ;;  %s714_s10 = smul.u32 24, %s1110_s27  ;;  %vm1118_vm6 = vmand %vm461_vm3, %vm462_vm4  ;;  %s268_s14 = scalar_lea.vmem [#allocation5], %s684_s28 }
  0x42   : > { %s499_s16 = sshll.u32 %s268_s14, 4  ;;  %s1128_s9 = scalar_lea.vmem [#allocation6], %s684_s28  ;;  %vm464_vm9 = vmor %vm1118_vm6, %vm1114_vm5  ;;  %s1142_s16 = int_to_ptr.vmem [resolvable:$true] %s499_s16 }
  0x43   : > { %689 = vmatmul.mubr.msk.bf16.vlgmr.msra.gmra.mrb[0].mxu0 %vm336_vm0, %v788_v7  ;;  %690 = vmatmul.mubr.msk.bf16.vlgmr.msra.gmra.mrb[0].mxu1 %vm336_vm0, %v789_v8  ;;  %v404_v27 = vsub.s32 %v401_v16, %v403_v17  ;;  %s1126_s24 = scalar_lea.vmem %s1248_s5, %s714_s10  ;;  %s515_s12 = sshll.u32 %s1128_s9, 4  ;;  %vm1146_vm10 = vmor %vm442_vm7, %vm443_vm8  ;;  %s1158_s12 = int_to_ptr.vmem [resolvable:$true] %s515_s12 }
  0x44   : > { %s1140_s15 = scalar_lea.hbm %s1246_s3, %s710_s11  ;;  %v465_v42 = vld [vmem:[%s1126_s24 + $0x10] sm:$0x11]  ;;  %s1156_s28 = scalar_lea.hbm %s1247_s4, %s710_s11 }
  0x45   : > { %320 = vperm.xlu0 %786, %v311_v11   ;;  %s469_s10 = scalar_lea.sflag [#allocation4], %s1085_s29  ;;  %s820_s30 = scalar_lea.vmem %s1142_s16, 32 }
  0x46   : > { %p821_p9 = scmp.ne.s32.totalorder %s1142_s16, %s820_s30  ;;  %p1262_p11 = scmp.ne.s32.totalorder %s1252_s6, 0 }
  0x47   : > { %s941_s17 = smov [#allocation5]  }
  0x48   : > { %p822_p0 = pnand %p821_p9, %p1262_p11  ;;  %s824_s21 = sshll.u32 %s941_s17, 4  ;;  %s825_s21 = int_to_ptr.vmem [resolvable:$false] %s824_s21 }
  0x49   : > { %s826_s13 = scalar_lea.vmem %s825_s21, 64  ;;  %p827_p13 = scmp.lt.s32.totalorder %s1142_s16, %s825_s21 }
  0x4a   : > { %p823_p6 = pneg %p822_p0  ;;  %p828_p2 = scmp.lt.s32.totalorder %s826_s13, %s820_s30 }
  0x4c   : > { %p829_p5 = por %p828_p2, %p827_p13 }
  0x4e   : > { %p830_p4 = pnand %p829_p5, %p823_p6 }
  0xc0   : > { %v316_v12 = vpop.permute.xlu0 %315  ;;  %v326_v18 = vpop.permute.xlu1 %325 }
  0xc4   : > { %v321_v19 = vpop.permute.xlu0 %320 }
 0x116   : > { %v377_v20 = vpop.f32.mrb[0].mxu0  ;;  %v387_v21 = vpop.f32.mrb[0].mxu1 }
 0x117   : > { %v378_v22 = vadd.f32 %v377_v20, %v316_v12  ;;  %v379_v23 = vpop.f32.mrb[1].mxu0  ;;  %v389_v24 = vpop.f32.mrb[1].mxu1  ;;  %v388_v25 = vadd.f32 %v387_v21, %v326_v18 }
 0x118   : > { %v380_v26 = vadd.f32 %v379_v23, %v316_v12  ;;  %v390_v29 = vadd.f32 %v389_v24, %v326_v18  ;;  %v381_v30 = vpop.f32.mrb[2].mxu0  ;;  %v391_v31 = vpop.f32.mrb[2].mxu1 }
 0x119   : > { %v382_v33 = vadd.f32 %v381_v30, %v321_v19  ;;  %v383_v34 = vpop.f32.mrb[3].mxu0  ;;  %v392_v35 = vpop.f32.mrb[3].mxu1 }
 0x11a   : > { %v691_v36 = vpack.c.bf16 %v380_v26, %v378_v22  ;;  %v709_v37 = vpack.c.bf16 %v390_v29, %v388_v25  ;;  %v384_v38 = vadd.f32 %v383_v34, %v321_v19 }
 0x11c   : > { %v405_v39 = vrot.slane %v691_v36, %v404_v27  ;;  %v1135_v40 = vrot.slane %v709_v37, 6  ;;  %v708_v41 = vpack.c.bf16 %v384_v38, %v382_v33  ;;  %v697_v45 = vrot.slane %v691_v36, 10 }
 0x11e   : > { %v415_v44 = vcombine.high %v405_v39, %v405_v39  ;;  %v452_v46 = vrot.slane %v1135_v40, 4  ;;  %v1151_v47 = vrot.slane %v708_v41, 6  ;;  %692 = vst.sshfl [vmem:[%s268_s14] sm:$0x5 pattern:$0x73625140] %v405_v39 }
 0x11f   : > { %833 = shalt.err (!%p830_p4)
}
 0x120   : > { %s834_s11 = scalar_lea.hbm %s1140_s15, 32  ;;  %s838_s27 = scalar_lea.hbm %s1246_s3, 64 }
 0x121   : > { %p835_p7 = scmp.ne.s32.totalorder %s1140_s15, %s834_s11  ;;  %p839_p1 = scmp.lt.u32.totalorder %s1140_s15, %s1246_s3 }
 0x122   : > { %p840_p3 = scmp.lt.u32.totalorder %s838_s27, %s834_s11  ;;  %p842_p9 = scmp.lt.u32.totalorder %s834_s11, %s1140_s15 }
 0x123   : > { %p836_p10 = pnand %p835_p7, %p1262_p11 }
 0x124   : > { %p841_p8 = por %p840_p3, %p839_p1 }
 0x125   : > { %p837_p12 = pneg %p836_p10 }
 0x126   : > { %p843_p0 = por %p842_p9, %p841_p8 }
 0x128   : > { %p844_p6 = pnand %p843_p0, %p837_p12 }
 0x12a   : > { %847 = shalt.err (!%p844_p6)
}
 0x12b   : > { %717 = dma.vmem_to_hbm [thread:$0]  (%p1262_p11), %s1142_s16, 32, %s1140_s15, %s469_s10   ;;  %v466_v48 = vsel %vm464_vm9, %v452_v46, %v465_v42  ;;  %v448_v49 = vsel %vm1146_vm10, %v697_v45, %v1151_v47  ;;  %v449_v50 = vrot.slane %v1151_v47, 4  ;;  %693 = vst.sshfl [vmem:[%s1128_s9] sm:$0x5 pattern:$0x73625140] %v415_v44 }
 0x12c   : > { %467 = vst [vmem:[%s1126_s24 + $0x10] sm:$0x11] %v466_v48  ;;  %456 = vst [vmem:[%s1126_s24] sm:$0xff] %v448_v49  ;;  %s474_s30 = scalar_lea.sflag [#allocation7], %s1085_s29  ;;  %s848_s13 = scalar_lea.vmem %s1158_s12, 32 }
 0x12d   : > { %p849_p13 = scmp.ne.s32.totalorder %s1158_s12, %s848_s13  ;;  %s942_s16 = smov [#allocation6]  }
 0x12e   : > { %s852_s15 = sshll.u32 %s942_s16, 4  ;;  %s853_s15 = int_to_ptr.vmem [resolvable:$false] %s852_s15 }
 0x12f   : > { %p850_p2 = pnand %p849_p13, %p1262_p11  ;;  %s854_s10 = scalar_lea.vmem %s853_s15, 64 }
 0x130   : > { %p855_p4 = scmp.lt.s32.totalorder %s1158_s12, %s853_s15  ;;  %p856_p7 = scmp.lt.s32.totalorder %s854_s10, %s848_s13 }
 0x131   : > { %p851_p5 = pneg %p850_p2 }
 0x132   : > { %p857_p10 = por %p856_p7, %p855_p4 }
 0x134   : > { %p858_p12 = pnand %p857_p10, %p851_p5 }
 0x136   : > { %861 = shalt.err (!%p858_p12)
}
 0x137   : > { %s862_s29 = scalar_lea.hbm %s1156_s28, 32  ;;  %s866_s14 = scalar_lea.hbm %s1247_s4, 64 }
 0x138   : > { %p863_p1 = scmp.ne.s32.totalorder %s1156_s28, %s862_s29  ;;  %p867_p9 = scmp.lt.u32.totalorder %s1156_s28, %s1247_s4 }
 0x139   : > { %p868_p0 = scmp.lt.u32.totalorder %s866_s14, %s862_s29  ;;  %p870_p13 = scmp.lt.u32.totalorder %s862_s29, %s1156_s28 }
 0x13a   : > { %p864_p3 = pnand %p863_p1, %p1262_p11 }
 0x13b   : > { %p869_p6 = por %p868_p0, %p867_p9 }
 0x13c   : > { %p865_p8 = pneg %p864_p3 }
 0x13d   : > { %p871_p2 = por %p870_p13, %p869_p6 }
 0x13f   : > { %p872_p5 = pnand %p871_p2, %p865_p8 }
 0x141   : > { %875 = shalt.err (!%p872_p5)
}
 0x142   : > { %718 = dma.vmem_to_hbm [thread:$0]  (%p1262_p11), %s1158_s12, 32, %s1156_s28, %s474_s30   ;;  %v451_v51 = vsel %vm1146_vm10, %v449_v50, %v1135_v40 }
 0x143   : > { %457 = vst [vmem:[%s1126_s24 + $0x8] sm:$0xff] %v451_v51 }
 0x144 PF: > { %s531_s17 = sand.u32 1, %s914_s18   ;;  %p1263_p4 = scmp.ne.s32.totalorder %s1253_s8, 0 }
 0x145   : > { %p1264_p7 = scmp.ge.s32.totalorder %s934_s23, 2  ;;  %s532_s21 = scalar_lea.sflag [#allocation4], %s531_s17 }
 0x147   : > { %p726_p10 = pnand %p1264_p7, %p1263_p4 }
 0x149   : > { %905 = dma.done.wait (!%p726_p10), %s532_s21, 32  }
 0x14a   : > { %907 = vsyncadd (!%p726_p10), %s532_s21, 4294967264  ;;  %s541_s6 = scalar_lea.sflag [#allocation7], %s531_s17 }
 0x14b   : > { %909 = dma.done.wait (!%p726_p10), %s541_s6, 32  }
 0x14c   : > { %911 = vsyncadd (!%p726_p10), %s541_s6, 4294967264  ;;  %s25_s23 = sadd.s32 1, %s934_s23   ;;  %s1265_s18 = smov %s918_s19 }
 0x14d   : > { %p22_p11 = scmp.ge.s32.totalorder %s25_s23, 4   ;;  %s1266_s19 = smov %s922_s20 }
 0x14e   : > { %s1267_s20 = smov %s1029_s7  ;;  %s1268_s21 = smov %s930_s22 }
 0x14f   : > { %s1269_s22 = smov %s1271_s26  ;;  %24 = sbr.rel (!%p22_p11) target bundleno = 8 (0x8), region = 106 }
 0x156   :  { %558 = vsyncpa [#allocation3], 1 }
 0x157   :  { %560 = vsyncpa [#allocation3 + $0x1], 1 }
 0x158   :  { %561 = vsyncpa [#allocation4], 1 }
 0x159   :  { %563 = vsyncpa [#allocation4 + $0x1], 1 }
 0x15a   :  { %564 = vsyncpa [#allocation7], 1 }
 0x15b   :  { %566 = vsyncpa [#allocation7 + $0x1], 1 }

</bundles_post_ra>
